<compile_context>
chip_gen: v5e
topology: v5e:2x2
jax: 0.10.0
libtpu: 0.0.40
codegen_flags: <defaults>
</compile_context>

<pallas_src>
import functools

import jax
import jax.numpy as jnp
import numpy as np
from jax import lax
from jax.experimental import pallas as pl
from jax.experimental.pallas import tpu as pltpu

LP = 128                     # lane width all activation / weight columns are padded to
# MNIST geometry (baked into the module via Linear(3*3*32, 128)):
H1, OH1 = 28, 14             # conv1: 28 -> 14  (stride 2, pad 1)
H2, OH2 = 14, 7              # conv2: 14 -> 7   (stride 2, pad 1)
H3, OH3 = 7, 3               # conv3: 7  -> 3   (stride 2, pad 0)
H1P, H2P = H1 + 1, H2 + 1    # one zero pad row on top of each image (vertical pad = 1)
KROWS = 3 * LP               # K of every conv / linear1 matmul after ky/h concatenation


# ------------------------------ Pallas kernel ------------------------------
def _encoder_kernel(x_ref, w_ref, c_ref, o_ref,
                    g1, a2, g2, a3, g3, g4, *, n, inv_bn, eps):
    f32, bf16 = jnp.float32, jnp.bfloat16

    # ---- Conv2d(1, 8, 3, s=2, p=1) + ReLU ---------------------------------
    # Gather (off the MXU): stride-2 row reads of the zero-top-padded input,
    # K-concatenated along lanes -> ONE matmul with K = 3*128.
    for b in range(n):
        for ky in range(3):
            g1[b * OH1:(b + 1) * OH1, ky * LP:(ky + 1) * LP] = \
                x_ref[pl.ds(b * H1P + ky, OH1, stride=2), :]
    y1 = jnp.dot(g1[...].astype(bf16), w_ref[0:KROWS, :],
                 preferred_element_type=f32)
    y1 = jnp.maximum(y1 + c_ref[0:1, :], 0.0)                       # (n*14, 128)

    # ---- Conv2d(8, 16, 3, s=2, p=1) ----------------------------------------
    for b in range(n):
        a2[b * H2P:b * H2P + 1, :] = jnp.zeros((1, LP), f32)        # vertical pad row
        a2[b * H2P + 1:(b + 1) * H2P, :] = y1[b * OH1:(b + 1) * OH1, :]
    for b in range(n):
        for ky in range(3):
            g2[b * OH2:(b + 1) * OH2, ky * LP:(ky + 1) * LP] = \
                a2[pl.ds(b * H2P + ky, OH2, stride=2), :]
    y2 = jnp.dot(g2[...].astype(bf16), w_ref[KROWS:2 * KROWS, :],
                 preferred_element_type=f32) + c_ref[1:2, :]        # (n*7, 128)

    # ---- BatchNorm2d(16), training mode (batch stats, biased var), two-pass
    pt = c_ref[7:7 + LP, :]                           # (128,128) reduce + channel-tile
    rsum = jnp.sum(y2, axis=0, keepdims=True)                       # (1,128) VPU
    mean_l = jnp.dot(rsum, pt, preferred_element_type=f32) * inv_bn  # per-channel, lane-tiled
    d = y2 - mean_l
    rsq = jnp.sum(d * d, axis=0, keepdims=True)
    var_l = jnp.dot(rsq, pt, preferred_element_type=f32) * inv_bn
    scale_l = c_ref[5:6, :] * lax.rsqrt(var_l + eps)                # gamma (pre-tiled)
    shift_l = c_ref[6:7, :] - mean_l * scale_l                      # beta  (pre-tiled)
    y2 = jnp.maximum(y2 * scale_l + shift_l, 0.0)                   # BN + ReLU

    # ---- Conv2d(16, 32, 3, s=2, p=0) + ReLU --------------------------------
    a3[...] = y2
    for b in range(n):
        for ky in range(3):
            g3[b * OH3:(b + 1) * OH3, ky * LP:(ky + 1) * LP] = \
                a3[pl.ds(b * H3 + ky, OH3, stride=2), :]
    y3 = jnp.dot(g3[...].astype(bf16), w_ref[2 * KROWS:3 * KROWS, :],
                 preferred_element_type=f32)
    y3 = jnp.maximum(y3 + c_ref[2:3, :], 0.0)                       # (n*3, 128)

    # ---- Flatten (NCHW order folded into Q_cat) + Linear(288, 128) + ReLU --
    for b in range(n):
        for h in range(OH3):
            g4[b:b + 1, h * LP:(h + 1) * LP] = y3[b * OH3 + h:b * OH3 + h + 1, :]
    lin = jnp.dot(g4[...].astype(bf16), w_ref[3 * KROWS:4 * KROWS, :],
                  preferred_element_type=f32)
    lin = jnp.maximum(lin + c_ref[3:4, :], 0.0)                     # (n, 128)

    # ---- Linear(128, embedding_dim), lane-padded to 128 -> dense store -----
    out = jnp.dot(lin.astype(bf16), w_ref[4 * KROWS:4 * KROWS + LP, :],
                  preferred_element_type=f32) + c_ref[4:5, :]
    o_ref[...] = out


# --------------------------- host-side preparation --------------------------
def _conv_wcat(w, b, w_in, stride, pad):
    """Fold one Conv2d into a single K-concatenated (3*128, 128) matmul matrix.

    Row index = ky*128 + (wx*cin + ci)   (input lane layout, w-major / c-minor)
    Col index = ox*cout + co             (output lane layout)
    Horizontal zero-padding is folded in (out-of-range wx never written);
    vertical padding is handled by the zero top row of the gathered activation.
    """
    w = np.asarray(w, np.float32)
    b = np.asarray(b, np.float32)
    cout, cin, kh, kw = w.shape
    ow = (w_in + 2 * pad - kw) // stride + 1
    wcat = np.zeros((kh * LP, LP), np.float32)
    for ky in range(kh):
        for ox in range(ow):
            for kx in range(kw):
                wx = stride * ox + kx - pad
                if 0 <= wx < w_in:
                    wcat[ky * LP + wx * cin: ky * LP + (wx + 1) * cin,
                         ox * cout:(ox + 1) * cout] = w[:, :, ky, kx].T
    brow = np.zeros((LP,), np.float32)
    brow[:ow * cout] = np.tile(b, ow)
    return wcat, brow


def prepare_params(p, embedding_dim):
    """One-time, batch-independent transform: PyTorch params -> 2 packed buffers."""
    w1c, b1r = _conv_wcat(p["w1"], p["b1"], 28, 2, 1)        # 28 -> 14
    w2c, b2r = _conv_wcat(p["w2"], p["b2"], 14, 2, 1)        # 14 -> 7
    w3c, b3r = _conv_wcat(p["w3"], p["b3"], 7, 2, 0)         # 7  -> 3
    c2 = int(np.asarray(p["w2"]).shape[0])                   # 16
    c3 = int(np.asarray(p["w3"]).shape[0])                   # 32
    # Linear(3*3*32 -> 128): fold PyTorch's channel-major flatten into the rows.
    wl1 = np.asarray(p["wl1"], np.float32).reshape(-1, c3, OH3, OH3)   # (128, c, h, w)
    qcat = np.zeros((3 * LP, LP), np.float32)
    for h in range(OH3):
        for w_ in range(OH3):
            qcat[h * LP + w_ * c3: h * LP + (w_ + 1) * c3, :] = wl1[:, :, h, w_].T
    # Linear(128 -> embedding_dim), transposed and lane-padded to 128 columns.
    w2t = np.zeros((LP, LP), np.float32)
    w2t[:, :embedding_dim] = np.asarray(p["wl2"], np.float32).T
    bl2r = np.zeros((LP,), np.float32)
    bl2r[:embedding_dim] = np.asarray(p["bl2"], np.float32)
    # Packed bf16 weight slab (single DMA): conv1 | conv2 | conv3 | lin1 | lin2.
    wbuf = np.concatenate([w1c, w2c, w3c, qcat, w2t], axis=0)          # (1664, 128)
    # Packed f32 constant slab (single DMA): bias rows, tiled gamma/beta, BN
    # reduce+tile matrix Pt (Pt[w*16+c, j] = 1 iff j%16 == c, zero for pad lanes).
    gam = np.tile(np.asarray(p["bn_g"], np.float32), LP // c2)
    bet = np.tile(np.asarray(p["bn_b"], np.float32), LP // c2)
    pt = np.zeros((LP, LP), np.float32)
    for wv in range(OH2):                        # 7 real w positions; lanes >=112 stay 0
        for c in range(c2):
            pt[wv * c2 + c, c::c2] = 1.0
    cbuf = np.concatenate(
        [np.stack([b1r, b2r, b3r, np.asarray(p["bl1"], np.float32), bl2r, gam, bet]),
         pt], axis=0)                                                  # (135, 128)
    return {"w": jnp.asarray(wbuf, jnp.bfloat16), "c": jnp.asarray(cbuf, jnp.float32)}


def _full_spec(shape):
    nd = len(shape)
    return pl.BlockSpec(shape, lambda: (0,) * nd)


@functools.partial(jax.jit, static_argnames=("emb",))
def encoder_forward(x_nchw, prep, *, emb):
    n, cin, h, w = x_nchw.shape
    assert (cin, h, w) == (1, 28, 28), "MNIST geometry is baked into the module"
    # Wrapper-side layout prep only: zero top row per image (conv1 vertical pad)
    # and lane pad 28 -> 128 so every in-kernel copy is 128-lane aligned.
    xp = jnp.pad(x_nchw.astype(jnp.float32).reshape(n, h, w),
                 ((0, 0), (1, 0), (0, LP - w))).reshape(n * H1P, LP)
    inv_bn = 1.0 / float(n * OH2 * OH2)          # 1 / (N*7*7) for BN batch stats
    kernel = functools.partial(_encoder_kernel, n=n, inv_bn=inv_bn, eps=1e-5)
    args = (xp, prep["w"], prep["c"])
    out = pl.pallas_call(
        kernel,
        out_shape=jax.ShapeDtypeStruct((n, LP), jnp.float32),   # lane-dense store
        in_specs=[_full_spec(a.shape) for a in args],
        out_specs=_full_spec((n, LP)),
        scratch_shapes=[
            pltpu.VMEM((n * OH1, 3 * LP), jnp.float32),   # g1: gathered conv1 input
            pltpu.VMEM((n * H2P, LP), jnp.float32),       # a2: zero-top-padded y1
            pltpu.VMEM((n * OH2, 3 * LP), jnp.float32),   # g2: gathered conv2 input
            pltpu.VMEM((n * H3, LP), jnp.float32),        # a3: y2 after BN + ReLU
            pltpu.VMEM((n * OH3, 3 * LP), jnp.float32),   # g3: gathered conv3 input
            pltpu.VMEM((n, 3 * LP), jnp.float32),         # g4: flattened linear1 input
        ],
    )(*args)
    return out[:, :emb]


# ---------------- deterministic synthetic params (PyTorch layouts) ----------------
def init_params(key, embedding_dim):
    ks = jax.random.split(key, 12)
    p = {}
    p["w1"] = jax.random.normal(ks[0], (8, 1, 3, 3), jnp.float32) * 0.2
    p["b1"] = jax.random.normal(ks[1], (8,), jnp.float32) * 0.05
    p["w2"] = jax.random.normal(ks[2], (16, 8, 3, 3), jnp.float32) * 0.2
    p["b2"] = jax.random.normal(ks[3], (16,), jnp.float32) * 0.05
    p["bn_g"] = 1.0 + 0.1 * jax.random.normal(ks[4], (16,), jnp.float32)
    p["bn_b"] = 0.05 * jax.random.normal(ks[5], (16,), jnp.float32)
    p["w3"] = jax.random.normal(ks[6], (32, 16, 3, 3), jnp.float32) * 0.1
    p["b3"] = jax.random.normal(ks[7], (32,), jnp.float32) * 0.05
    p["wl1"] = jax.random.normal(ks[8], (128, 3 * 3 * 32), jnp.float32) * 0.05
    p["bl1"] = jax.random.normal(ks[9], (128,), jnp.float32) * 0.05
    p["wl2"] = jax.random.normal(ks[10], (embedding_dim, 128), jnp.float32) * 0.05
    p["bl2"] = jax.random.normal(ks[11], (embedding_dim,), jnp.float32) * 0.05
    return p


# Pure-JAX reference (mirrors the PyTorch module, training-mode BN) for self-check.
def reference_forward(x_nchw, p, eps=1e-5):
    dn = ("NCHW", "OIHW", "NCHW")
    y = lax.conv_general_dilated(x_nchw, p["w1"], (2, 2), ((1, 1), (1, 1)),
                                 dimension_numbers=dn)
    y = jax.nn.relu(y + p["b1"][None, :, None, None])
    y = lax.conv_general_dilated(y, p["w2"], (2, 2), ((1, 1), (1, 1)),
                                 dimension_numbers=dn)
    y = y + p["b2"][None, :, None, None]
    mean = jnp.mean(y, axis=(0, 2, 3), keepdims=True)
    var = jnp.mean((y - mean) ** 2, axis=(0, 2, 3), keepdims=True)
    y = (y - mean) / jnp.sqrt(var + eps) * p["bn_g"][None, :, None, None] \
        + p["bn_b"][None, :, None, None]
    y = jax.nn.relu(y)
    y = lax.conv_general_dilated(y, p["w3"], (2, 2), ((0, 0), (0, 0)),
                                 dimension_numbers=dn)
    y = jax.nn.relu(y + p["b3"][None, :, None, None])
    y = y.reshape(y.shape[0], -1)
    y = jax.nn.relu(y @ p["wl1"].T + p["bl1"])
    y = y @ p["wl2"].T + p["bl2"]
    return y


if __name__ == "__main__":
    key = jax.random.PRNGKey(0)
    k_x, k_p = jax.random.split(key)
    embedding_dim = 32
    batch = 2
    # MNIST geometry is baked into the module (3*3*32 -> Linear), so spatial = 28.
    x = jax.random.normal(k_x, (batch, 1, 28, 28), jnp.float32)
    params = init_params(k_p, embedding_dim)
    prep = prepare_params(params, embedding_dim)   # one-time, batch-independent

    out = jax.block_until_ready(encoder_forward(x, prep, emb=embedding_dim))
    assert out.shape == (batch, embedding_dim)

    ref = jax.block_until_ready(reference_forward(x, params))
    # Tolerance allows for the bf16 MXU operands (perf-review item); reference is f32.
    np.testing.assert_allclose(np.asarray(out), np.asarray(ref), rtol=2e-2, atol=2e-2)

    print("KERNEL_OK")
</pallas_src>

<mosaic_0001>
module attributes {stable_mosaic.version = 11 : i64} {
  func.func @_encoder_kernel(%arg0: memref<58x128xf32, #tpu.memory_space<vmem>>, %arg1: memref<1664x128xbf16, #tpu.memory_space<vmem>>, %arg2: memref<135x128xf32, #tpu.memory_space<vmem>>, %arg3: memref<2x128xf32, #tpu.memory_space<vmem>>, %arg4: memref<28x384xf32, #tpu.memory_space<vmem>>, %arg5: memref<30x128xf32, #tpu.memory_space<vmem>>, %arg6: memref<14x384xf32, #tpu.memory_space<vmem>>, %arg7: memref<14x128xf32, #tpu.memory_space<vmem>>, %arg8: memref<6x384xf32, #tpu.memory_space<vmem>>, %arg9: memref<2x384xf32, #tpu.memory_space<vmem>>) attributes {dimension_semantics = [], scalar_prefetch = 0 : i64, scratch_operands = 6 : i64, tpu.core_type = #tpu.core_type<tc>} {
    %c0 = arith.constant 0 : index
    %c0_0 = arith.constant 0 : index
    %0 = tpu.strided_load %arg0[%c0, %c0_0] {strides = array<i32: 2, 1>} : memref<58x128xf32, #tpu.memory_space<vmem>>, vector<14x128xf32>
    %c0_1 = arith.constant 0 : index
    %c0_2 = arith.constant 0 : index
    %1 = vector.load %arg4[%c0_1, %c0_2] : memref<28x384xf32, #tpu.memory_space<vmem>>, vector<14x128xf32>
    tpu.vector_store %arg4[%c0_1, %c0_2], %0 {strides = array<i32>} : memref<28x384xf32, #tpu.memory_space<vmem>>, vector<14x128xf32>,
    %c1 = arith.constant 1 : index
    %c0_3 = arith.constant 0 : index
    %2 = tpu.strided_load %arg0[%c1, %c0_3] {strides = array<i32: 2, 1>} : memref<58x128xf32, #tpu.memory_space<vmem>>, vector<14x128xf32>
    %c0_4 = arith.constant 0 : index
    %c128 = arith.constant 128 : index
    %3 = vector.load %arg4[%c0_4, %c128] : memref<28x384xf32, #tpu.memory_space<vmem>>, vector<14x128xf32>
    tpu.vector_store %arg4[%c0_4, %c128], %2 {strides = array<i32>} : memref<28x384xf32, #tpu.memory_space<vmem>>, vector<14x128xf32>,
    %c2 = arith.constant 2 : index
    %c0_5 = arith.constant 0 : index
    %4 = tpu.strided_load %arg0[%c2, %c0_5] {strides = array<i32: 2, 1>} : memref<58x128xf32, #tpu.memory_space<vmem>>, vector<14x128xf32>
    %c0_6 = arith.constant 0 : index
    %c256 = arith.constant 256 : index
    %5 = vector.load %arg4[%c0_6, %c256] : memref<28x384xf32, #tpu.memory_space<vmem>>, vector<14x128xf32>
    tpu.vector_store %arg4[%c0_6, %c256], %4 {strides = array<i32>} : memref<28x384xf32, #tpu.memory_space<vmem>>, vector<14x128xf32>,
    %c29 = arith.constant 29 : index
    %c0_7 = arith.constant 0 : index
    %6 = tpu.strided_load %arg0[%c29, %c0_7] {strides = array<i32: 2, 1>} : memref<58x128xf32, #tpu.memory_space<vmem>>, vector<14x128xf32>
    %c14 = arith.constant 14 : index
    %c0_8 = arith.constant 0 : index
    %7 = vector.load %arg4[%c14, %c0_8] : memref<28x384xf32, #tpu.memory_space<vmem>>, vector<14x128xf32>
    tpu.vector_store %arg4[%c14, %c0_8], %6 {strides = array<i32>} : memref<28x384xf32, #tpu.memory_space<vmem>>, vector<14x128xf32>,
    %c30 = arith.constant 30 : index
    %c0_9 = arith.constant 0 : index
    %8 = tpu.strided_load %arg0[%c30, %c0_9] {strides = array<i32: 2, 1>} : memref<58x128xf32, #tpu.memory_space<vmem>>, vector<14x128xf32>
    %c14_10 = arith.constant 14 : index
    %c128_11 = arith.constant 128 : index
    %9 = vector.load %arg4[%c14_10, %c128_11] : memref<28x384xf32, #tpu.memory_space<vmem>>, vector<14x128xf32>
    tpu.vector_store %arg4[%c14_10, %c128_11], %8 {strides = array<i32>} : memref<28x384xf32, #tpu.memory_space<vmem>>, vector<14x128xf32>,
    %c31 = arith.constant 31 : index
    %c0_12 = arith.constant 0 : index
    %10 = tpu.strided_load %arg0[%c31, %c0_12] {strides = array<i32: 2, 1>} : memref<58x128xf32, #tpu.memory_space<vmem>>, vector<14x128xf32>
    %c14_13 = arith.constant 14 : index
    %c256_14 = arith.constant 256 : index
    %11 = vector.load %arg4[%c14_13, %c256_14] : memref<28x384xf32, #tpu.memory_space<vmem>>, vector<14x128xf32>
    tpu.vector_store %arg4[%c14_13, %c256_14], %10 {strides = array<i32>} : memref<28x384xf32, #tpu.memory_space<vmem>>, vector<14x128xf32>,
    %c0_15 = arith.constant 0 : index
    %c0_16 = arith.constant 0 : index
    %12 = vector.load %arg4[%c0_15, %c0_16] : memref<28x384xf32, #tpu.memory_space<vmem>>, vector<28x384xf32>
    %13 = arith.truncf %12 : vector<28x384xf32> to vector<28x384xbf16>
    %c0_17 = arith.constant 0 : index
    %c0_18 = arith.constant 0 : index
    %14 = vector.load %arg1[%c0_17, %c0_18] : memref<1664x128xbf16, #tpu.memory_space<vmem>>, vector<384x128xbf16>
    %cst = arith.constant dense<0.000000e+00> : vector<28x128xf32>
    %15 = tpu.matmul %13, %14, %cst {dimension_numbers = #tpu.dot_dimension_numbers<[1], [0], [0], [1], [0, 0, 1, 1], [], []>} : vector<28x384xbf16>, vector<384x128xbf16>, vector<28x128xf32> -> vector<28x128xf32>
    %c0_19 = arith.constant 0 : index
    %c0_20 = arith.constant 0 : index
    %16 = vector.load %arg2[%c0_19, %c0_20] : memref<135x128xf32, #tpu.memory_space<vmem>>, vector<1x128xf32>
    %17 = vector.broadcast %16 : vector<1x128xf32> to vector<28x128xf32>
    %18 = arith.addf %15, %17 : vector<28x128xf32>
    %cst_21 = arith.constant 0.000000e+00 : f32
    %19 = vector.broadcast %cst_21 : f32 to vector<28x128xf32>
    %20 = arith.maximumf %18, %19 : vector<28x128xf32>
    %cst_22 = arith.constant 0.000000e+00 : f32
    %21 = vector.broadcast %cst_22 : f32 to vector<1x128xf32>
    %c0_23 = arith.constant 0 : index
    %c0_24 = arith.constant 0 : index
    %22 = vector.load %arg5[%c0_23, %c0_24] : memref<30x128xf32, #tpu.memory_space<vmem>>, vector<1x128xf32>
    tpu.vector_store %arg5[%c0_23, %c0_24], %21 {strides = array<i32>} : memref<30x128xf32, #tpu.memory_space<vmem>>, vector<1x128xf32>,
    %23 = vector.extract_strided_slice %20 {offsets = [0, 0], sizes = [14, 128], strides = [1, 1]} : vector<28x128xf32> to vector<14x128xf32>
    %c1_25 = arith.constant 1 : index
    %c0_26 = arith.constant 0 : index
    %24 = vector.load %arg5[%c1_25, %c0_26] : memref<30x128xf32, #tpu.memory_space<vmem>>, vector<14x128xf32>
    tpu.vector_store %arg5[%c1_25, %c0_26], %23 {strides = array<i32>} : memref<30x128xf32, #tpu.memory_space<vmem>>, vector<14x128xf32>,
    %cst_27 = arith.constant 0.000000e+00 : f32
    %25 = vector.broadcast %cst_27 : f32 to vector<1x128xf32>
    %c15 = arith.constant 15 : index
    %c0_28 = arith.constant 0 : index
    %26 = vector.load %arg5[%c15, %c0_28] : memref<30x128xf32, #tpu.memory_space<vmem>>, vector<1x128xf32>
    tpu.vector_store %arg5[%c15, %c0_28], %25 {strides = array<i32>} : memref<30x128xf32, #tpu.memory_space<vmem>>, vector<1x128xf32>,
    %27 = vector.extract_strided_slice %20 {offsets = [14, 0], sizes = [14, 128], strides = [1, 1]} : vector<28x128xf32> to vector<14x128xf32>
    %c16 = arith.constant 16 : index
    %c0_29 = arith.constant 0 : index
    %28 = vector.load %arg5[%c16, %c0_29] : memref<30x128xf32, #tpu.memory_space<vmem>>, vector<14x128xf32>
    tpu.vector_store %arg5[%c16, %c0_29], %27 {strides = array<i32>} : memref<30x128xf32, #tpu.memory_space<vmem>>, vector<14x128xf32>,
    %c0_30 = arith.constant 0 : index
    %c0_31 = arith.constant 0 : index
    %29 = tpu.strided_load %arg5[%c0_30, %c0_31] {strides = array<i32: 2, 1>} : memref<30x128xf32, #tpu.memory_space<vmem>>, vector<7x128xf32>
    %c0_32 = arith.constant 0 : index
    %c0_33 = arith.constant 0 : index
    %30 = vector.load %arg6[%c0_32, %c0_33] : memref<14x384xf32, #tpu.memory_space<vmem>>, vector<7x128xf32>
    tpu.vector_store %arg6[%c0_32, %c0_33], %29 {strides = array<i32>} : memref<14x384xf32, #tpu.memory_space<vmem>>, vector<7x128xf32>,
    %c1_34 = arith.constant 1 : index
    %c0_35 = arith.constant 0 : index
    %31 = tpu.strided_load %arg5[%c1_34, %c0_35] {strides = array<i32: 2, 1>} : memref<30x128xf32, #tpu.memory_space<vmem>>, vector<7x128xf32>
    %c0_36 = arith.constant 0 : index
    %c128_37 = arith.constant 128 : index
    %32 = vector.load %arg6[%c0_36, %c128_37] : memref<14x384xf32, #tpu.memory_space<vmem>>, vector<7x128xf32>
    tpu.vector_store %arg6[%c0_36, %c128_37], %31 {strides = array<i32>} : memref<14x384xf32, #tpu.memory_space<vmem>>, vector<7x128xf32>,
    %c2_38 = arith.constant 2 : index
    %c0_39 = arith.constant 0 : index
    %33 = tpu.strided_load %arg5[%c2_38, %c0_39] {strides = array<i32: 2, 1>} : memref<30x128xf32, #tpu.memory_space<vmem>>, vector<7x128xf32>
    %c0_40 = arith.constant 0 : index
    %c256_41 = arith.constant 256 : index
    %34 = vector.load %arg6[%c0_40, %c256_41] : memref<14x384xf32, #tpu.memory_space<vmem>>, vector<7x128xf32>
    tpu.vector_store %arg6[%c0_40, %c256_41], %33 {strides = array<i32>} : memref<14x384xf32, #tpu.memory_space<vmem>>, vector<7x128xf32>,
    %c15_42 = arith.constant 15 : index
    %c0_43 = arith.constant 0 : index
    %35 = tpu.strided_load %arg5[%c15_42, %c0_43] {strides = array<i32: 2, 1>} : memref<30x128xf32, #tpu.memory_space<vmem>>, vector<7x128xf32>
    %c7 = arith.constant 7 : index
    %c0_44 = arith.constant 0 : index
    %36 = vector.load %arg6[%c7, %c0_44] : memref<14x384xf32, #tpu.memory_space<vmem>>, vector<7x128xf32>
    tpu.vector_store %arg6[%c7, %c0_44], %35 {strides = array<i32>} : memref<14x384xf32, #tpu.memory_space<vmem>>, vector<7x128xf32>,
    %c16_45 = arith.constant 16 : index
    %c0_46 = arith.constant 0 : index
    %37 = tpu.strided_load %arg5[%c16_45, %c0_46] {strides = array<i32: 2, 1>} : memref<30x128xf32, #tpu.memory_space<vmem>>, vector<7x128xf32>
    %c7_47 = arith.constant 7 : index
    %c128_48 = arith.constant 128 : index
    %38 = vector.load %arg6[%c7_47, %c128_48] : memref<14x384xf32, #tpu.memory_space<vmem>>, vector<7x128xf32>
    tpu.vector_store %arg6[%c7_47, %c128_48], %37 {strides = array<i32>} : memref<14x384xf32, #tpu.memory_space<vmem>>, vector<7x128xf32>,
    %c17 = arith.constant 17 : index
    %c0_49 = arith.constant 0 : index
    %39 = tpu.strided_load %arg5[%c17, %c0_49] {strides = array<i32: 2, 1>} : memref<30x128xf32, #tpu.memory_space<vmem>>, vector<7x128xf32>
    %c7_50 = arith.constant 7 : index
    %c256_51 = arith.constant 256 : index
    %40 = vector.load %arg6[%c7_50, %c256_51] : memref<14x384xf32, #tpu.memory_space<vmem>>, vector<7x128xf32>
    tpu.vector_store %arg6[%c7_50, %c256_51], %39 {strides = array<i32>} : memref<14x384xf32, #tpu.memory_space<vmem>>, vector<7x128xf32>,
    %c0_52 = arith.constant 0 : index
    %c0_53 = arith.constant 0 : index
    %41 = vector.load %arg6[%c0_52, %c0_53] : memref<14x384xf32, #tpu.memory_space<vmem>>, vector<14x384xf32>
    %42 = arith.truncf %41 : vector<14x384xf32> to vector<14x384xbf16>
    %c384 = arith.constant 384 : index
    %c0_54 = arith.constant 0 : index
    %43 = vector.load %arg1[%c384, %c0_54] : memref<1664x128xbf16, #tpu.memory_space<vmem>>, vector<384x128xbf16>
    %cst_55 = arith.constant dense<0.000000e+00> : vector<14x128xf32>
    %44 = tpu.matmul %42, %43, %cst_55 {dimension_numbers = #tpu.dot_dimension_numbers<[1], [0], [0], [1], [0, 0, 1, 1], [], []>} : vector<14x384xbf16>, vector<384x128xbf16>, vector<14x128xf32> -> vector<14x128xf32>
    %c1_56 = arith.constant 1 : index
    %c0_57 = arith.constant 0 : index
    %45 = vector.load %arg2[%c1_56, %c0_57] : memref<135x128xf32, #tpu.memory_space<vmem>>, vector<1x128xf32>
    %46 = vector.broadcast %45 : vector<1x128xf32> to vector<14x128xf32>
    %47 = arith.addf %44, %46 : vector<14x128xf32>
    %c7_58 = arith.constant 7 : index
    %c0_59 = arith.constant 0 : index
    %48 = vector.load %arg2[%c7_58, %c0_59] : memref<135x128xf32, #tpu.memory_space<vmem>>, vector<128x128xf32>
    %cst_60 = arith.constant dense<0.000000e+00> : vector<128xf32>
    %49 = vector.multi_reduction <add>, %47, %cst_60 [0] : vector<14x128xf32> to vector<128xf32>
    %50 = vector.shape_cast %49 : vector<128xf32> to vector<1x128xf32>
    %cst_61 = arith.constant dense<0.000000e+00> : vector<1x128xf32>
    %51 = tpu.matmul %50, %48, %cst_61 {dimension_numbers = #tpu.dot_dimension_numbers<[1], [0], [0], [1], [0, 0, 1, 1], [], []>} : vector<1x128xf32>, vector<128x128xf32>, vector<1x128xf32> -> vector<1x128xf32>
    %cst_62 = arith.constant 0.0102040814 : f32
    %52 = vector.broadcast %cst_62 : f32 to vector<1x128xf32>
    %53 = arith.mulf %51, %52 : vector<1x128xf32>
    %54 = vector.broadcast %53 : vector<1x128xf32> to vector<14x128xf32>
    %55 = arith.subf %47, %54 : vector<14x128xf32>
    %56 = arith.mulf %55, %55 : vector<14x128xf32>
    %cst_63 = arith.constant dense<0.000000e+00> : vector<128xf32>
    %57 = vector.multi_reduction <add>, %56, %cst_63 [0] : vector<14x128xf32> to vector<128xf32>
    %58 = vector.shape_cast %57 : vector<128xf32> to vector<1x128xf32>
    %cst_64 = arith.constant dense<0.000000e+00> : vector<1x128xf32>
    %59 = tpu.matmul %58, %48, %cst_64 {dimension_numbers = #tpu.dot_dimension_numbers<[1], [0], [0], [1], [0, 0, 1, 1], [], []>} : vector<1x128xf32>, vector<128x128xf32>, vector<1x128xf32> -> vector<1x128xf32>
    %cst_65 = arith.constant 0.0102040814 : f32
    %60 = vector.broadcast %cst_65 : f32 to vector<1x128xf32>
    %61 = arith.mulf %59, %60 : vector<1x128xf32>
    %c5 = arith.constant 5 : index
    %c0_66 = arith.constant 0 : index
    %62 = vector.load %arg2[%c5, %c0_66] : memref<135x128xf32, #tpu.memory_space<vmem>>, vector<1x128xf32>
    %cst_67 = arith.constant 9.99999974E-6 : f32
    %63 = vector.broadcast %cst_67 : f32 to vector<1x128xf32>
    %64 = arith.addf %61, %63 : vector<1x128xf32>
    %65 = math.rsqrt %64 : vector<1x128xf32>
    %66 = arith.mulf %62, %65 : vector<1x128xf32>
    %c6 = arith.constant 6 : index
    %c0_68 = arith.constant 0 : index
    %67 = vector.load %arg2[%c6, %c0_68] : memref<135x128xf32, #tpu.memory_space<vmem>>, vector<1x128xf32>
    %68 = arith.mulf %53, %66 : vector<1x128xf32>
    %69 = arith.subf %67, %68 : vector<1x128xf32>
    %70 = vector.broadcast %66 : vector<1x128xf32> to vector<14x128xf32>
    %71 = arith.mulf %47, %70 : vector<14x128xf32>
    %72 = vector.broadcast %69 : vector<1x128xf32> to vector<14x128xf32>
    %73 = arith.addf %71, %72 : vector<14x128xf32>
    %cst_69 = arith.constant 0.000000e+00 : f32
    %74 = vector.broadcast %cst_69 : f32 to vector<14x128xf32>
    %75 = arith.maximumf %73, %74 : vector<14x128xf32>
    %c0_70 = arith.constant 0 : index
    %c0_71 = arith.constant 0 : index
    %76 = vector.load %arg7[%c0_70, %c0_71] : memref<14x128xf32, #tpu.memory_space<vmem>>, vector<14x128xf32>
    tpu.vector_store %arg7[%c0_70, %c0_71], %75 {strides = array<i32>} : memref<14x128xf32, #tpu.memory_space<vmem>>, vector<14x128xf32>,
    %c0_72 = arith.constant 0 : index
    %c0_73 = arith.constant 0 : index
    %77 = tpu.strided_load %arg7[%c0_72, %c0_73] {strides = array<i32: 2, 1>} : memref<14x128xf32, #tpu.memory_space<vmem>>, vector<3x128xf32>
    %c0_74 = arith.constant 0 : index
    %c0_75 = arith.constant 0 : index
    %78 = vector.load %arg8[%c0_74, %c0_75] : memref<6x384xf32, #tpu.memory_space<vmem>>, vector<3x128xf32>
    tpu.vector_store %arg8[%c0_74, %c0_75], %77 {strides = array<i32>} : memref<6x384xf32, #tpu.memory_space<vmem>>, vector<3x128xf32>,
    %c1_76 = arith.constant 1 : index
    %c0_77 = arith.constant 0 : index
    %79 = tpu.strided_load %arg7[%c1_76, %c0_77] {strides = array<i32: 2, 1>} : memref<14x128xf32, #tpu.memory_space<vmem>>, vector<3x128xf32>
    %c0_78 = arith.constant 0 : index
    %c128_79 = arith.constant 128 : index
    %80 = vector.load %arg8[%c0_78, %c128_79] : memref<6x384xf32, #tpu.memory_space<vmem>>, vector<3x128xf32>
    tpu.vector_store %arg8[%c0_78, %c128_79], %79 {strides = array<i32>} : memref<6x384xf32, #tpu.memory_space<vmem>>, vector<3x128xf32>,
    %c2_80 = arith.constant 2 : index
    %c0_81 = arith.constant 0 : index
    %81 = tpu.strided_load %arg7[%c2_80, %c0_81] {strides = array<i32: 2, 1>} : memref<14x128xf32, #tpu.memory_space<vmem>>, vector<3x128xf32>
    %c0_82 = arith.constant 0 : index
    %c256_83 = arith.constant 256 : index
    %82 = vector.load %arg8[%c0_82, %c256_83] : memref<6x384xf32, #tpu.memory_space<vmem>>, vector<3x128xf32>
    tpu.vector_store %arg8[%c0_82, %c256_83], %81 {strides = array<i32>} : memref<6x384xf32, #tpu.memory_space<vmem>>, vector<3x128xf32>,
    %c7_84 = arith.constant 7 : index
    %c0_85 = arith.constant 0 : index
    %83 = tpu.strided_load %arg7[%c7_84, %c0_85] {strides = array<i32: 2, 1>} : memref<14x128xf32, #tpu.memory_space<vmem>>, vector<3x128xf32>
    %c3 = arith.constant 3 : index
    %c0_86 = arith.constant 0 : index
    %84 = vector.load %arg8[%c3, %c0_86] : memref<6x384xf32, #tpu.memory_space<vmem>>, vector<3x128xf32>
    tpu.vector_store %arg8[%c3, %c0_86], %83 {strides = array<i32>} : memref<6x384xf32, #tpu.memory_space<vmem>>, vector<3x128xf32>,
    %c8 = arith.constant 8 : index
    %c0_87 = arith.constant 0 : index
    %85 = tpu.strided_load %arg7[%c8, %c0_87] {strides = array<i32: 2, 1>} : memref<14x128xf32, #tpu.memory_space<vmem>>, vector<3x128xf32>
    %c3_88 = arith.constant 3 : index
    %c128_89 = arith.constant 128 : index
    %86 = vector.load %arg8[%c3_88, %c128_89] : memref<6x384xf32, #tpu.memory_space<vmem>>, vector<3x128xf32>
    tpu.vector_store %arg8[%c3_88, %c128_89], %85 {strides = array<i32>} : memref<6x384xf32, #tpu.memory_space<vmem>>, vector<3x128xf32>,
    %c9 = arith.constant 9 : index
    %c0_90 = arith.constant 0 : index
    %87 = tpu.strided_load %arg7[%c9, %c0_90] {strides = array<i32: 2, 1>} : memref<14x128xf32, #tpu.memory_space<vmem>>, vector<3x128xf32>
    %c3_91 = arith.constant 3 : index
    %c256_92 = arith.constant 256 : index
    %88 = vector.load %arg8[%c3_91, %c256_92] : memref<6x384xf32, #tpu.memory_space<vmem>>, vector<3x128xf32>
    tpu.vector_store %arg8[%c3_91, %c256_92], %87 {strides = array<i32>} : memref<6x384xf32, #tpu.memory_space<vmem>>, vector<3x128xf32>,
    %c0_93 = arith.constant 0 : index
    %c0_94 = arith.constant 0 : index
    %89 = vector.load %arg8[%c0_93, %c0_94] : memref<6x384xf32, #tpu.memory_space<vmem>>, vector<6x384xf32>
    %90 = arith.truncf %89 : vector<6x384xf32> to vector<6x384xbf16>
    %c768 = arith.constant 768 : index
    %c0_95 = arith.constant 0 : index
    %91 = vector.load %arg1[%c768, %c0_95] : memref<1664x128xbf16, #tpu.memory_space<vmem>>, vector<384x128xbf16>
    %cst_96 = arith.constant dense<0.000000e+00> : vector<6x128xf32>
    %92 = tpu.matmul %90, %91, %cst_96 {dimension_numbers = #tpu.dot_dimension_numbers<[1], [0], [0], [1], [0, 0, 1, 1], [], []>} : vector<6x384xbf16>, vector<384x128xbf16>, vector<6x128xf32> -> vector<6x128xf32>
    %c2_97 = arith.constant 2 : index
    %c0_98 = arith.constant 0 : index
    %93 = vector.load %arg2[%c2_97, %c0_98] : memref<135x128xf32, #tpu.memory_space<vmem>>, vector<1x128xf32>
    %94 = vector.broadcast %93 : vector<1x128xf32> to vector<6x128xf32>
    %95 = arith.addf %92, %94 : vector<6x128xf32>
    %cst_99 = arith.constant 0.000000e+00 : f32
    %96 = vector.broadcast %cst_99 : f32 to vector<6x128xf32>
    %97 = arith.maximumf %95, %96 : vector<6x128xf32>
    %98 = vector.extract_strided_slice %97 {offsets = [0, 0], sizes = [1, 128], strides = [1, 1]} : vector<6x128xf32> to vector<1x128xf32>
    %c0_100 = arith.constant 0 : index
    %c0_101 = arith.constant 0 : index
    %99 = vector.load %arg9[%c0_100, %c0_101] : memref<2x384xf32, #tpu.memory_space<vmem>>, vector<1x128xf32>
    tpu.vector_store %arg9[%c0_100, %c0_101], %98 {strides = array<i32>} : memref<2x384xf32, #tpu.memory_space<vmem>>, vector<1x128xf32>,
    %100 = vector.extract_strided_slice %97 {offsets = [1, 0], sizes = [1, 128], strides = [1, 1]} : vector<6x128xf32> to vector<1x128xf32>
    %c0_102 = arith.constant 0 : index
    %c128_103 = arith.constant 128 : index
    %101 = vector.load %arg9[%c0_102, %c128_103] : memref<2x384xf32, #tpu.memory_space<vmem>>, vector<1x128xf32>
    tpu.vector_store %arg9[%c0_102, %c128_103], %100 {strides = array<i32>} : memref<2x384xf32, #tpu.memory_space<vmem>>, vector<1x128xf32>,
    %102 = vector.extract_strided_slice %97 {offsets = [2, 0], sizes = [1, 128], strides = [1, 1]} : vector<6x128xf32> to vector<1x128xf32>
    %c0_104 = arith.constant 0 : index
    %c256_105 = arith.constant 256 : index
    %103 = vector.load %arg9[%c0_104, %c256_105] : memref<2x384xf32, #tpu.memory_space<vmem>>, vector<1x128xf32>
    tpu.vector_store %arg9[%c0_104, %c256_105], %102 {strides = array<i32>} : memref<2x384xf32, #tpu.memory_space<vmem>>, vector<1x128xf32>,
    %104 = vector.extract_strided_slice %97 {offsets = [3, 0], sizes = [1, 128], strides = [1, 1]} : vector<6x128xf32> to vector<1x128xf32>
    %c1_106 = arith.constant 1 : index
    %c0_107 = arith.constant 0 : index
    %105 = vector.load %arg9[%c1_106, %c0_107] : memref<2x384xf32, #tpu.memory_space<vmem>>, vector<1x128xf32>
    tpu.vector_store %arg9[%c1_106, %c0_107], %104 {strides = array<i32>} : memref<2x384xf32, #tpu.memory_space<vmem>>, vector<1x128xf32>,
    %106 = vector.extract_strided_slice %97 {offsets = [4, 0], sizes = [1, 128], strides = [1, 1]} : vector<6x128xf32> to vector<1x128xf32>
    %c1_108 = arith.constant 1 : index
    %c128_109 = arith.constant 128 : index
    %107 = vector.load %arg9[%c1_108, %c128_109] : memref<2x384xf32, #tpu.memory_space<vmem>>, vector<1x128xf32>
    tpu.vector_store %arg9[%c1_108, %c128_109], %106 {strides = array<i32>} : memref<2x384xf32, #tpu.memory_space<vmem>>, vector<1x128xf32>,
    %108 = vector.extract_strided_slice %97 {offsets = [5, 0], sizes = [1, 128], strides = [1, 1]} : vector<6x128xf32> to vector<1x128xf32>
    %c1_110 = arith.constant 1 : index
    %c256_111 = arith.constant 256 : index
    %109 = vector.load %arg9[%c1_110, %c256_111] : memref<2x384xf32, #tpu.memory_space<vmem>>, vector<1x128xf32>
    tpu.vector_store %arg9[%c1_110, %c256_111], %108 {strides = array<i32>} : memref<2x384xf32, #tpu.memory_space<vmem>>, vector<1x128xf32>,
    %c0_112 = arith.constant 0 : index
    %c0_113 = arith.constant 0 : index
    %110 = vector.load %arg9[%c0_112, %c0_113] : memref<2x384xf32, #tpu.memory_space<vmem>>, vector<2x384xf32>
    %111 = arith.truncf %110 : vector<2x384xf32> to vector<2x384xbf16>
    %c1152 = arith.constant 1152 : index
    %c0_114 = arith.constant 0 : index
    %112 = vector.load %arg1[%c1152, %c0_114] : memref<1664x128xbf16, #tpu.memory_space<vmem>>, vector<384x128xbf16>
    %cst_115 = arith.constant dense<0.000000e+00> : vector<2x128xf32>
    %113 = tpu.matmul %111, %112, %cst_115 {dimension_numbers = #tpu.dot_dimension_numbers<[1], [0], [0], [1], [0, 0, 1, 1], [], []>} : vector<2x384xbf16>, vector<384x128xbf16>, vector<2x128xf32> -> vector<2x128xf32>
    %c3_116 = arith.constant 3 : index
    %c0_117 = arith.constant 0 : index
    %114 = vector.load %arg2[%c3_116, %c0_117] : memref<135x128xf32, #tpu.memory_space<vmem>>, vector<1x128xf32>
    %115 = vector.broadcast %114 : vector<1x128xf32> to vector<2x128xf32>
    %116 = arith.addf %113, %115 : vector<2x128xf32>
    %cst_118 = arith.constant 0.000000e+00 : f32
    %117 = vector.broadcast %cst_118 : f32 to vector<2x128xf32>
    %118 = arith.maximumf %116, %117 : vector<2x128xf32>
    %119 = arith.truncf %118 : vector<2x128xf32> to vector<2x128xbf16>
    %c1536 = arith.constant 1536 : index
    %c0_119 = arith.constant 0 : index
    %120 = vector.load %arg1[%c1536, %c0_119] : memref<1664x128xbf16, #tpu.memory_space<vmem>>, vector<128x128xbf16>
    %cst_120 = arith.constant dense<0.000000e+00> : vector<2x128xf32>
    %121 = tpu.matmul %119, %120, %cst_120 {dimension_numbers = #tpu.dot_dimension_numbers<[1], [0], [0], [1], [0, 0, 1, 1], [], []>} : vector<2x128xbf16>, vector<128x128xbf16>, vector<2x128xf32> -> vector<2x128xf32>
    %c4 = arith.constant 4 : index
    %c0_121 = arith.constant 0 : index
    %122 = vector.load %arg2[%c4, %c0_121] : memref<135x128xf32, #tpu.memory_space<vmem>>, vector<1x128xf32>
    %123 = vector.broadcast %122 : vector<1x128xf32> to vector<2x128xf32>
    %124 = arith.addf %121, %123 : vector<2x128xf32>
    %c0_122 = arith.constant 0 : index
    %c0_123 = arith.constant 0 : index
    %125 = vector.load %arg3[%c0_122, %c0_123] : memref<2x128xf32, #tpu.memory_space<vmem>>, vector<2x128xf32>
    tpu.vector_store %arg3[%c0_122, %c0_123], %124 {strides = array<i32>} : memref<2x128xf32, #tpu.memory_space<vmem>>, vector<2x128xf32>,
    return
  }
}

</mosaic_0001>

<bundles_post_ra>
// kernel: encoder_forward.1
= control target key start
LH: loop header
LB: loop body
LE: loop exit
PB: predicated region body
PF: predicated region fallthrough
CT: control target
= control target key end

     0   :  { %8 = vsyncpa [#allocation9], 0  ;;  %s2158_s0 = inlined_call_operand.vmem [shape: f32[58,128], index: 0, kind: input, shape index: {}]   ;;  %s2159_s1 = inlined_call_operand.hbm [shape: bf16[1664,128], index: 1, kind: input, shape index: {}]   ;;  %s2160_s2 = inlined_call_operand.vmem [shape: f32[135,128], index: 2, kind: input, shape index: {}]   ;;  %s2161_s3 = inlined_call_operand.hbm [shape: f32[2,128], index: 3, kind: output, shape index: {}]  }
   0x1   :  { %9 = vsyncpa [#allocation10], 0  ;;  %s16_s14 = sshll.u32 %s2159_s1, 4  ;;  %s1991_s15 = smov [#allocation8]   ;;  %s17_s14 = int_to_ptr.hbm [resolvable:$true] %s16_s14 }
   0x2   :  { %s18_s16 = sshll.u32 %s1991_s15, 4  ;;  %s1992_s17 = smov 64   ;;  %s19_s16 = int_to_ptr.vmem [resolvable:$true] %s18_s16 }
   0x3   :  { %s1993_s18 = smov 4  }
   0x4   :  { %24 = dma.hbm_to_vmem [thread:$0]  %s17_s14, 13312, %s19_s16, [#allocation9], %s1992_s17, %s1992_s17, %s1993_s18  }
   0x5   :  { %1987 = dma.done.wait [#allocation9], 13312  }
   0x6   :  { %1988 = vsyncadd [#allocation9], 4294953984  ;;  %v1830_v0 = vld [vmem:[#allocation8 + $0x38] sm:$0xff]  ;;  %v1829_v3 = vld [vmem:[#allocation8 + $0x30] sm:$0xff]  ;;  %vm54_vm0 = vcmask 1045504   ;;  %v1994_v57 = vmov 0.0  }
   0x7   :  { %v1838_v1 = vld [vmem:[#allocation8 + $0x78] sm:$0xff]  ;;  %306 = vmatpush.bf16.msra.mxu0 %v1830_v0  ;;  %v1837_v4 = vld [vmem:[#allocation8 + $0x70] sm:$0xff]  ;;  %v1828_v6 = vld [vmem:[#allocation8 + $0x28] sm:$0xff]  ;;  %367 = vst [vmem:[#allocation3] sm:$0x1] %v1994_v57  ;;  %s1995_s30 = smov [#allocation11]  }
   0x8   :  { %v1846_v2 = vld [vmem:[#allocation8 + $0xb8] sm:$0xff]  ;;  %325 = vmatpush.bf16.msra.mxu1 %v1838_v1  ;;  %v1845_v5 = vld [vmem:[#allocation8 + $0xb0] sm:$0xff]  ;;  %v1836_v7 = vld [vmem:[#allocation8 + $0x68] sm:$0xff]  ;;  %370 = vst [vmem:[#allocation3 + $0xf] sm:$0x1] %v1994_v57  ;;  %s1381_s4 = sshll.u32 %s1995_s30, 4  ;;  %s1382_s4 = int_to_ptr.vmem [resolvable:$true] %s1381_s4 }
   0x9   :  { %344 = vmatpush.bf16.msra.mxu2 %v1846_v2  ;;  %v1844_v8 = vld [vmem:[#allocation8 + $0xa8] sm:$0xff]  ;;  %v1827_v9 = vld [vmem:[#allocation8 + $0x20] sm:$0xff]  ;;  %v1826_v19 = vld [vmem:[#allocation8 + $0x18] sm:$0xff]  ;;  %s1383_s7 = sshll.u32 %s2161_s3, 4  ;;  %s1384_s7 = int_to_ptr.hbm [resolvable:$true] %s1383_s7 }
   0xa   :  { %v2022_v10 = vld [vmem:[%s2158_s0] ss:$2 sm:$0xff]  ;;  %v1393_v11 = vld [vmem:[%s2158_s0 + $0x10] ss:$2 sm:$0x3f] }
   0xb   :  { %307 = vmatpush.bf16.msra.mxu0 %v1829_v3  ;;  %v1835_v12 = vld [vmem:[#allocation8 + $0x60] sm:$0xff]  ;;  %35 = vst [vmem:[#allocation2] sm:$0x3f] %v1393_v11  ;;  %v1395_v16 = vld [vmem:[%s2158_s0 + $0x11] ss:$2 sm:$0x3f] }
   0xc   :  { %326 = vmatpush.bf16.msra.mxu1 %v1837_v4  ;;  %v1398_v13 = vld [vmem:[%s2158_s0 + $0x1d] ss:$2 sm:$0xff]  ;;  %v1400_v18 = vld [vmem:[%s2158_s0 + $0x1e] ss:$2 sm:$0xff]  ;;  %41 = vst [vmem:[#allocation2 + $0x20] sm:$0x3f] %v1395_v16 }
   0xd   :  { %345 = vmatpush.bf16.msra.mxu2 %v1845_v5  ;;  %v2033_v14 = vld [vmem:[%s2158_s0 + $0x1] ss:$2 sm:$0xff]  ;;  %v55_v15 = vrot.slane %v1398_v13, 2  ;;  %v70_v21 = vrot.slane %v1400_v18, 2  ;;  %v1396_v22 = vld [vmem:[%s2158_s0 + $0x2] ss:$2 sm:$0xff] }
   0xe   :  { %v1843_v17 = vld [vmem:[#allocation8 + $0xa0] sm:$0xff]  ;;  %v1834_v20 = vld [vmem:[#allocation8 + $0x58] sm:$0xff]  ;;  %v1397_v23 = vld [vmem:[%s2158_s0 + $0x12] ss:$2 sm:$0x3f] }
   0xf   :  { %308 = vmatpush.bf16.msra.mxu0 %v1828_v6  ;;  %61 = vst [vmem:[#allocation2] sm:$0xc0] %v55_v15  ;;  %v1402_v24 = vld [vmem:[%s2158_s0 + $0x1f] ss:$2 sm:$0xff]  ;;  %v1825_v33 = vld [vmem:[#allocation8 + $0x10] sm:$0xff]  ;;  %v1824_v39 = vld [vmem:[#allocation8 + $0x8] sm:$0xff] }
  0x10   :  { %327 = vmatpush.bf16.msra.mxu1 %v1836_v7  ;;  %76 = vst [vmem:[#allocation2 + $0x20] sm:$0xc0] %v70_v21  ;;  %v85_v25 = vrot.slane %v1402_v24, 2  ;;  %v1399_v26 = vld [vmem:[%s2158_s0 + $0x2d] ss:$2 sm:$0x3f] }
  0x11   :  { %346 = vmatpush.bf16.msra.mxu2 %v1844_v8  ;;  %v1842_v27 = vld [vmem:[#allocation8 + $0x98] sm:$0xff]  ;;  %v56_v28 = vrot.slane %v1399_v26, 2  ;;  %v1401_v29 = vld [vmem:[%s2158_s0 + $0x2e] ss:$2 sm:$0x3f]  ;;  %v1823_v42 = vld [vmem:[#allocation8] sm:$0xff] }
  0x12   :  { %47 = vst [vmem:[#allocation2 + $0x10] sm:$0x3f] %v1397_v23  ;;  %v1403_v30 = vld [vmem:[%s2158_s0 + $0x2f] ss:$2 sm:$0x3f]  ;;  %v71_v32 = vrot.slane %v1401_v29, 2 }
  0x13   :  { %309 = vmatpush.bf16.msra.mxu0 %v1827_v9  ;;  %91 = vst [vmem:[#allocation2 + $0x10] sm:$0xc0] %v85_v25  ;;  %v57_v31 = vsel %vm54_vm0, %v55_v15, %v56_v28  ;;  %v1833_v34 = vld [vmem:[#allocation8 + $0x50] sm:$0xff]  ;;  %v86_v37 = vrot.slane %v1403_v30, 2  ;;  %v1832_v40 = vld [vmem:[#allocation8 + $0x48] sm:$0xff]  ;;  %v1831_v43 = vld [vmem:[#allocation8 + $0x40] sm:$0xff] }
  0x14   :  { %328 = vmatpush.bf16.msra.mxu1 %v1835_v12  ;;  %v1841_v35 = vld [vmem:[#allocation8 + $0x90] sm:$0xff]  ;;  %63 = vst [vmem:[#allocation2 + $0x48] sm:$0xf] %v56_v28  ;;  %v72_v36 = vsel %vm54_vm0, %v70_v21, %v71_v32  ;;  %v1840_v41 = vld [vmem:[#allocation8 + $0x88] sm:$0xff]  ;;  %v1839_v46 = vld [vmem:[#allocation8 + $0x80] sm:$0xff] }
  0x15   :  { %347 = vmatpush.bf16.msra.mxu2 %v1843_v17  ;;  %78 = vst [vmem:[#allocation2 + $0x50] sm:$0xf] %v71_v32  ;;  %v87_v38 = vsel %vm54_vm0, %v85_v25, %v86_v37  ;;  %v1854_v58 = vld [vmem:[#allocation8 + $0xf8] sm:$0xff]  ;;  %v1853_v62 = vld [vmem:[#allocation8 + $0xf0] sm:$0xff]  ;;  %v1852_v5 = vld [vmem:[#allocation8 + $0xe8] sm:$0xff] }
  0x16   :  { %93 = vst [vmem:[#allocation2 + $0x38] sm:$0xf] %v86_v37  ;;  %v97_v44 = vld [vmem:[#allocation2] sm:$0xff]  ;;  %v1862_v59 = vld [vmem:[#allocation8 + $0x138] sm:$0xff]  ;;  %606 = vmatpush.bf16.msra.mxu3 %v1854_v58  ;;  %v1861_v63 = vld [vmem:[#allocation8 + $0x130] sm:$0xff] }
  0x17   :  { %310 = vmatpush.bf16.msra.mxu0 %v1826_v19  ;;  %v98_v45 = vld [vmem:[#allocation2 + $0x20] sm:$0xff]  ;;  %v106_v48 = vpack.c.bf16 %v97_v44, %v2022_v10  ;;  %v1870_v60 = vld [vmem:[#allocation8 + $0x178] sm:$0xff]  ;;  %v1869_v0 = vld [vmem:[#allocation8 + $0x170] sm:$0xff] }
  0x18   :  { %329 = vmatpush.bf16.msra.mxu1 %v1834_v20  ;;  %v107_v49 = vpack.c.bf16 %v98_v45, %v2033_v14  ;;  %v2067_v61 = vld [vmem:[%s2160_s2] ss:$0 sm:$0xff]  ;;  %v1860_v6 = vld [vmem:[#allocation8 + $0x128] sm:$0xff]  ;;  %v1851_v11 = vld [vmem:[#allocation8 + $0xe0] sm:$0xff] }
  0x19   :  { %348 = vmatpush.bf16.msra.mxu2 %v1842_v27  ;;  %v1868_v7 = vld [vmem:[#allocation8 + $0x168] sm:$0xff]  ;;  %v1859_v12 = vld [vmem:[#allocation8 + $0x120] sm:$0xff]  ;;  %v1850_v17 = vld [vmem:[#allocation8 + $0xd8] sm:$0xff] }
  0x1a   :  { %v99_v47 = vld [vmem:[#allocation2 + $0x10] sm:$0xff]  ;;  %607 = vmatpush.bf16.msra.mxu3 %v1853_v62  ;;  %v1867_v13 = vld [vmem:[#allocation8 + $0x160] sm:$0xff]  ;;  %v1848_v30 = vld [vmem:[#allocation8 + $0xc8] sm:$0xff] }
  0x1b   :  { %311 = vmatpush.bf16.msra.mxu0 %v1825_v33  ;;  %v108_v50 = vpack.c.bf16 %v99_v47, %v1396_v22  ;;  %v103_v51 = vld [vmem:[#allocation2 + $0x48] sm:$0xf]  ;;  %v1858_v18 = vld [vmem:[#allocation8 + $0x118] sm:$0xff]  ;;  %v1849_v24 = vld [vmem:[#allocation8 + $0xd0] sm:$0xff] }
  0x1c   :  { %330 = vmatpush.bf16.msra.mxu1 %v1833_v34  ;;  %v104_v52 = vld [vmem:[#allocation2 + $0x50] sm:$0xf]  ;;  %v109_v54 = vpack.c.bf16 %v103_v51, %v57_v31  ;;  %v1866_v19 = vld [vmem:[#allocation8 + $0x158] sm:$0xff]  ;;  %v1856_v31 = vld [vmem:[#allocation8 + $0x108] sm:$0xff] }
  0x1d   :  { %349 = vmatpush.bf16.msra.mxu2 %v1841_v35  ;;  %v105_v53 = vld [vmem:[#allocation2 + $0x38] sm:$0xf]  ;;  %v110_v55 = vpack.c.bf16 %v104_v52, %v72_v36  ;;  %v1857_v25 = vld [vmem:[#allocation8 + $0x110] sm:$0xff]  ;;  %v1864_v32 = vld [vmem:[#allocation8 + $0x148] sm:$0xff] }
  0x1e   :  { %v111_v56 = vpack.c.bf16 %v105_v53, %v87_v38  ;;  %608 = vmatpush.bf16.msra.mxu3 %v1852_v5  ;;  %v1865_v26 = vld [vmem:[#allocation8 + $0x150] sm:$0xff]  ;;  %v1847_v34 = vld [vmem:[#allocation8 + $0xc0] sm:$0xff] }
  0x1f   :  { %312 = vmatpush.bf16.msra.mxu0 %v1824_v39  ;;  %v1855_v35 = vld [vmem:[#allocation8 + $0x100] sm:$0xff] }
  0x20   :  { %331 = vmatpush.bf16.msra.mxu1 %v1832_v40  ;;  %v1863_v37 = vld [vmem:[#allocation8 + $0x140] sm:$0xff] }
  0x21   :  { %350 = vmatpush.bf16.msra.mxu2 %v1840_v41  ;;  %v659_v5 = vld [vmem:[%s2160_s2 + $0x5f] sm:$0xff] }
  0x22   :  { %609 = vmatpush.bf16.msra.mxu3 %v1851_v11  ;;  %v653_v11 = vld [vmem:[%s2160_s2 + $0x2f] sm:$0xff] }
  0x23   :  { %313 = vmatpush.bf16.msra.mxu0 %v1823_v42 }
  0x24   :  { %332 = vmatpush.bf16.msra.mxu1 %v1831_v43 }
  0x25   :  { %351 = vmatpush.bf16.msra.mxu2 %v1839_v46 }
  0x26   :  { %314 = vmatmul.bf16.vlgmr.msra.gmra.mxu0 %v106_v48  ;;  %610 = vmatpush.bf16.msra.mxu3 %v1850_v17 }
  0x27   :  { %333 = vmatmul.bf16.vlgmr.msra.gmra.mxu1 %v107_v49  ;;  %620 = vmatpush.bf16.msrb.mxu0 %v1862_v59 }
  0x28   :  { %352 = vmatmul.bf16.vlgmr.msra.gmra.mxu2 %v108_v50  ;;  %634 = vmatpush.bf16.msrb.mxu1 %v1870_v60 }
  0x2a   :  { %611 = vmatpush.bf16.msra.mxu3 %v1849_v24 }
  0x2b   :  { %621 = vmatpush.bf16.msrb.mxu0 %v1861_v63 }
  0x2c   :  { %635 = vmatpush.bf16.msrb.mxu1 %v1869_v0 }
  0x2e   :  { %612 = vmatpush.bf16.msra.mxu3 %v1848_v30 }
  0x2f   :  { %622 = vmatpush.bf16.msrb.mxu0 %v1860_v6  ;;  %v658_v6 = vld [vmem:[%s2160_s2 + $0x57] sm:$0xff] }
  0x30   :  { %636 = vmatpush.bf16.msrb.mxu1 %v1868_v7  ;;  %v657_v7 = vld [vmem:[%s2160_s2 + $0x4f] sm:$0xff] }
  0x32   :  { %613 = vmatpush.bf16.msra.mxu3 %v1847_v34 }
  0x33   :  { %623 = vmatpush.bf16.msrb.mxu0 %v1859_v12  ;;  %v652_v12 = vld [vmem:[%s2160_s2 + $0x27] sm:$0xff] }
  0x34   :  { %637 = vmatpush.bf16.msrb.mxu1 %v1867_v13  ;;  %v651_v13 = vld [vmem:[%s2160_s2 + $0x1f] sm:$0xff] }
  0x36   :  { %319 = vmatmul.bf16.gmra.mxu0 %v109_v54 }
  0x37   :  { %338 = vmatmul.bf16.gmra.mxu1 %v110_v55  ;;  %624 = vmatpush.bf16.msrb.mxu0 %v1858_v18 }
  0x38   :  { %357 = vmatmul.bf16.gmra.mxu2 %v111_v56  ;;  %638 = vmatpush.bf16.msrb.mxu1 %v1866_v19 }
  0x3b   :  { %625 = vmatpush.bf16.msrb.mxu0 %v1857_v25 }
  0x3c   :  { %639 = vmatpush.bf16.msrb.mxu1 %v1865_v26 }
  0x3f   :  { %626 = vmatpush.bf16.msrb.mxu0 %v1856_v31 }
  0x40   :  { %640 = vmatpush.bf16.msrb.mxu1 %v1864_v32 }
  0x43   :  { %627 = vmatpush.bf16.msrb.mxu0 %v1855_v35 }
  0x44   :  { %641 = vmatpush.bf16.msrb.mxu1 %v1863_v37 }
  0xa3   :  { %v315_v1 = vpop.f32.mrf.mxu0 }
  0xa4   :  { %v334_v2 = vpop.f32.mrf.mxu1  ;;  %v316_v3 = vadd.f32 %v2067_v61, %v315_v1  ;;  %v663_v1 = vld [vmem:[%s2160_s2 + $0x7f] sm:$0xff] }
  0xa5   :  { %672 = vmatpush.msrb.mxu2 %v663_v1  ;;  %706 = vmatpush.msrb.mxu3 %v663_v1  ;;  %v1875_v1 = vld [vmem:[#allocation8 + $0x1a0] sm:$0xff] }
  0xa6   :  { %v335_v4 = vadd.f32 %v334_v2, %v316_v3  ;;  %v662_v2 = vld [vmem:[%s2160_s2 + $0x77] sm:$0xff]  ;;  %v661_v3 = vld [vmem:[%s2160_s2 + $0x6f] sm:$0xff] }
  0xa7   :  { %673 = vmatpush.msrb.mxu2 %v662_v2  ;;  %707 = vmatpush.msrb.mxu3 %v662_v2  ;;  %v1883_v2 = vld [vmem:[#allocation8 + $0x1e0] sm:$0xff] }
  0xa9   :  { %674 = vmatpush.msrb.mxu2 %v661_v3  ;;  %708 = vmatpush.msrb.mxu3 %v661_v3  ;;  %v1891_v3 = vld [vmem:[#allocation8 + $0x220] sm:$0xff] }
  0xab   :  { %v353_v8 = vpop.f32.mrf.mxu2  ;;  %v317_v10 = vpop.f32.mrf.mxu0 }
  0xac   :  { %v354_v9 = vadd.f32 %v353_v8, %v335_v4  ;;  %v336_v14 = vpop.f32.mrf.mxu1  ;;  %v318_v16 = vadd.f32 %v2067_v61, %v317_v10  ;;  %v660_v4 = vld [vmem:[%s2160_s2 + $0x67] sm:$0xff]  ;;  %v654_v10 = vld [vmem:[%s2160_s2 + $0x37] sm:$0xff] }
  0xad   :  { %675 = vmatpush.msrb.mxu2 %v660_v4  ;;  %709 = vmatpush.msrb.mxu3 %v660_v4  ;;  %v656_v8 = vld [vmem:[%s2160_s2 + $0x47] sm:$0xff]  ;;  %v1874_v4 = vld [vmem:[#allocation8 + $0x198] sm:$0xff] }
  0xae   :  { %v363_v15 = vmax.f32 %v354_v9, 0.0  ;;  %v337_v20 = vadd.f32 %v336_v14, %v318_v16  ;;  %v655_v9 = vld [vmem:[%s2160_s2 + $0x3f] sm:$0xff]  ;;  %v650_v14 = vld [vmem:[%s2160_s2 + $0x17] sm:$0xff]  ;;  %v648_v16 = vld [vmem:[%s2160_s2 + $0x7] sm:$0xff] }
  0xaf   :  { %676 = vmatpush.msrb.mxu2 %v659_v5  ;;  %710 = vmatpush.msrb.mxu3 %v659_v5  ;;  %v1882_v5 = vld [vmem:[#allocation8 + $0x1d8] sm:$0xff] }
  0xb0   :  { %368 = vst [vmem:[#allocation3 + $0x1] sm:$0xff] %v363_v15  ;;  %v649_v15 = vld [vmem:[%s2160_s2 + $0xf] sm:$0xff] }
  0xb1   :  { %677 = vmatpush.msrb.mxu2 %v658_v6  ;;  %711 = vmatpush.msrb.mxu3 %v658_v6  ;;  %v1890_v6 = vld [vmem:[#allocation8 + $0x218] sm:$0xff] }
  0xb3   :  { %v355_v21 = vpop.f32.mrf.mxu2  ;;  %v320_v23 = vpop.f32.mrf.mxu0  ;;  %678 = vmatpush.msrb.mxu2 %v657_v7  ;;  %712 = vmatpush.msrb.mxu3 %v657_v7 }
  0xb4   :  { %v356_v22 = vadd.f32 %v355_v21, %v337_v20  ;;  %v321_v27 = vadd.f32 %v2067_v61, %v320_v23  ;;  %v339_v29 = vpop.f32.mrf.mxu1  ;;  %v1933_v20 = vld [vmem:[%s2160_s2 + $0x1] ss:$0 sm:$0xff] }
  0xb5   :  { %679 = vmatpush.msrb.mxu2 %v656_v8  ;;  %713 = vmatpush.msrb.mxu3 %v656_v8 }
  0xb6   :  { %v364_v28 = vmax.f32 %v356_v22, 0.0  ;;  %v340_v33 = vadd.f32 %v339_v29, %v321_v27 }
  0xb7   :  { %680 = vmatpush.msrb.mxu2 %v655_v9  ;;  %714 = vmatpush.msrb.mxu3 %v655_v9  ;;  %v1873_v9 = vld [vmem:[#allocation8 + $0x190] sm:$0xff] }
  0xb8   :  { %369 = vst [vmem:[#allocation3 + $0x9] sm:$0x3f] %v364_v28 }
  0xb9   :  { %371 = vst [vmem:[#allocation3 + $0xa] sm:$0xc0] %v364_v28  ;;  %681 = vmatpush.msrb.mxu2 %v654_v10  ;;  %715 = vmatpush.msrb.mxu3 %v654_v10  ;;  %v1881_v10 = vld [vmem:[#allocation8 + $0x1d0] sm:$0xff] }
  0xbb   :  { %v358_v36 = vpop.f32.mrf.mxu2  ;;  %v322_v39 = vpop.f32.mrf.mxu0  ;;  %682 = vmatpush.msrb.mxu2 %v653_v11  ;;  %716 = vmatpush.msrb.mxu3 %v653_v11  ;;  %v1889_v11 = vld [vmem:[#allocation8 + $0x210] sm:$0xff] }
  0xbc   :  { %v359_v38 = vadd.f32 %v358_v36, %v340_v33  ;;  %v323_v41 = vadd.f32 %v2067_v61, %v322_v39  ;;  %v341_v45 = vpop.f32.mrf.mxu1 }
  0xbd   :  { %683 = vmatpush.msrb.mxu2 %v652_v12  ;;  %717 = vmatpush.msrb.mxu3 %v652_v12 }
  0xbe   :  { %v365_v40 = vmax.f32 %v359_v38, 0.0  ;;  %v342_v46 = vadd.f32 %v341_v45, %v323_v41 }
  0xbf   :  { %v374_v42 = vld [vmem:[#allocation3] ss:$2 sm:$0x7f]  ;;  %v377_v43 = vld [vmem:[#allocation3 + $0x1] ss:$2 sm:$0x7f]  ;;  %684 = vmatpush.msrb.mxu2 %v651_v13  ;;  %718 = vmatpush.msrb.mxu3 %v651_v13 }
  0xc0   :  { %378 = vst [vmem:[#allocation4] sm:$0x7f] %v377_v43  ;;  %v380_v44 = vld [vmem:[#allocation3 + $0x2] ss:$2 sm:$0x7f] }
  0xc1   :  { %381 = vst [vmem:[#allocation4 + $0x10] sm:$0x7f] %v380_v44  ;;  %685 = vmatpush.msrb.mxu2 %v650_v14  ;;  %719 = vmatpush.msrb.mxu3 %v650_v14  ;;  %v1872_v14 = vld [vmem:[#allocation8 + $0x188] sm:$0xff] }
  0xc2   :  { %375 = vst [vmem:[#allocation4 + $0x8] sm:$0x7f] %v374_v42 }
  0xc3   :  { %372 = vst [vmem:[#allocation3 + $0x12] sm:$0xff] %v365_v40  ;;  %v360_v47 = vpop.f32.mrf.mxu2  ;;  %686 = vmatpush.msrb.mxu2 %v649_v15  ;;  %720 = vmatpush.msrb.mxu3 %v649_v15  ;;  %v1880_v15 = vld [vmem:[#allocation8 + $0x1c8] sm:$0xff] }
  0xc4   :  { %v361_v48 = vadd.f32 %v360_v47, %v342_v46 }
  0xc5   :  { %687 = vmatpush.msrb.mxu2 %v648_v16  ;;  %721 = vmatpush.msrb.mxu3 %v648_v16  ;;  %v1888_v16 = vld [vmem:[#allocation8 + $0x208] sm:$0xff] }
  0xc6   :  { %v366_v49 = vmax.f32 %v361_v48, 0.0 }
  0xc8   :  { %373 = vst [vmem:[#allocation3 + $0x1a] sm:$0xf] %v366_v49 }
  0xcf   :  { %v383_v50 = vld [vmem:[#allocation3 + $0xf] ss:$2 sm:$0x7f]  ;;  %v390_v51 = vld [vmem:[#allocation3 + $0x10] ss:$2 sm:$0x7f] }
  0xd0   :  { %v385_v52 = vrot.slane %v383_v50, 1  ;;  %v392_v53 = vrot.slane %v390_v51, 1  ;;  %v397_v54 = vld [vmem:[#allocation3 + $0x11] ss:$2 sm:$0x7f] }
  0xd1   :  { %v399_v55 = vrot.slane %v397_v54, 1  ;;  %v1886_v54 = vld [vmem:[#allocation8 + $0x1f8] sm:$0xff] }
  0xd2   :  { %387 = vst [vmem:[#allocation4 + $0x8] sm:$0x80] %v385_v52  ;;  %992 = vmatpush.bf16.msra.mxu1 %v1886_v54 }
  0xd3   :  { %388 = vst [vmem:[#allocation4 + $0x20] sm:$0x3f] %v385_v52 }
  0xd4   :  { %394 = vst [vmem:[#allocation4] sm:$0x80] %v392_v53 }
  0xd5   :  { %395 = vst [vmem:[#allocation4 + $0x28] sm:$0x3f] %v392_v53  ;;  %v1878_v53 = vld [vmem:[#allocation8 + $0x1b8] sm:$0xff] }
  0xd6   :  { %401 = vst [vmem:[#allocation4 + $0x10] sm:$0x80] %v399_v55  ;;  %979 = vmatpush.bf16.msra.mxu0 %v1878_v53 }
  0xd7   :  { %402 = vst [vmem:[#allocation4 + $0x18] sm:$0x3f] %v399_v55  ;;  %v1894_v55 = vld [vmem:[#allocation8 + $0x238] sm:$0xff] }
  0xd8   :  { %1005 = vmatpush.bf16.msra.mxu2 %v1894_v55  ;;  %v1902_v55 = vld [vmem:[#allocation8 + $0x278] sm:$0xff] }
  0xd9   :  { %v403_v56 = vld [vmem:[#allocation4 + $0x8] sm:$0xff] }
  0xda   :  { %v406_v57 = vld [vmem:[#allocation4 + $0x20] sm:$0x3f] }
  0xdb   :  { %v409_v58 = vpack.c.bf16 %v406_v57, %v403_v56  ;;  %v404_v59 = vld [vmem:[#allocation4] sm:$0xff]  ;;  %v1877_v56 = vld [vmem:[#allocation8 + $0x1b0] sm:$0xff] }
  0xdc   :  { %v407_v60 = vld [vmem:[#allocation4 + $0x28] sm:$0x3f]  ;;  %v1885_v57 = vld [vmem:[#allocation8 + $0x1f0] sm:$0xff]  ;;  %980 = vmatpush.bf16.msra.mxu0 %v1877_v56  ;;  %v1910_v56 = vld [vmem:[#allocation8 + $0x2b8] sm:$0xff] }
  0xdd   :  { %614 = vmatmul.bf16.vlgmr.msra.gmra.mxu3 %v409_v58  ;;  %v410_v61 = vpack.c.bf16 %v407_v60, %v404_v59  ;;  %v405_v62 = vld [vmem:[#allocation4 + $0x10] sm:$0xff]  ;;  %993 = vmatpush.bf16.msra.mxu1 %v1885_v57 }
  0xde   :  { %v408_v63 = vld [vmem:[#allocation4 + $0x18] sm:$0x3f]  ;;  %v1893_v58 = vld [vmem:[#allocation8 + $0x230] sm:$0xff]  ;;  %1255 = vmatpush.bf16.msra.mxu3 %v1902_v55 }
  0xdf   :  { %628 = vmatmul.bf16.vlgmr.msrb.gmra.mxu0 %v410_v61  ;;  %v411_v0 = vpack.c.bf16 %v408_v63, %v405_v62  ;;  %1006 = vmatpush.bf16.msra.mxu2 %v1893_v58  ;;  %v1876_v61 = vld [vmem:[#allocation8 + $0x1a8] sm:$0xff]  ;;  %v1918_v57 = vld [vmem:[#allocation8 + $0x2f8] sm:$0xff] }
  0xe0   :  { %v1884_v62 = vld [vmem:[#allocation8 + $0x1e8] sm:$0xff]  ;;  %981 = vmatpush.bf16.msra.mxu0 %v1876_v61  ;;  %v1909_v61 = vld [vmem:[#allocation8 + $0x2b0] sm:$0xff] }
  0xe1   :  { %642 = vmatmul.bf16.vlgmr.msrb.gmra.mxu1 %v411_v0  ;;  %v1892_v63 = vld [vmem:[#allocation8 + $0x228] sm:$0xff] }
  0xe2   :  { %994 = vmatpush.bf16.msra.mxu1 %v1884_v62  ;;  %v1917_v62 = vld [vmem:[#allocation8 + $0x2f0] sm:$0xff] }
  0xe3   :  { %1007 = vmatpush.bf16.msra.mxu2 %v1892_v63 }
  0xe4   :  { %982 = vmatpush.bf16.msra.mxu0 %v1875_v1 }
  0xe6   :  { %995 = vmatpush.bf16.msra.mxu1 %v1883_v2 }
  0xe7   :  { %1008 = vmatpush.bf16.msra.mxu2 %v1891_v3  ;;  %v1900_v3 = vld [vmem:[#allocation8 + $0x268] sm:$0xff] }
  0xe8   :  { %983 = vmatpush.bf16.msra.mxu0 %v1874_v4  ;;  %v1908_v4 = vld [vmem:[#allocation8 + $0x2a8] sm:$0xff] }
  0xea   :  { %996 = vmatpush.bf16.msra.mxu1 %v1882_v5  ;;  %v1916_v5 = vld [vmem:[#allocation8 + $0x2e8] sm:$0xff] }
  0xeb   :  { %1009 = vmatpush.bf16.msra.mxu2 %v1890_v6 }
  0xec   :  { %984 = vmatpush.bf16.msra.mxu0 %v1873_v9  ;;  %v1915_v9 = vld [vmem:[#allocation8 + $0x2e0] sm:$0xff] }
  0xee   :  { %997 = vmatpush.bf16.msra.mxu1 %v1881_v10 }
  0xef   :  { %1010 = vmatpush.bf16.msra.mxu2 %v1889_v11  ;;  %v1898_v11 = vld [vmem:[#allocation8 + $0x258] sm:$0xff] }
  0xf0   :  { %985 = vmatpush.bf16.msra.mxu0 %v1872_v14 }
  0xf2   :  { %998 = vmatpush.bf16.msra.mxu1 %v1880_v15  ;;  %v1897_v15 = vld [vmem:[#allocation8 + $0x250] sm:$0xff] }
  0xf3   :  { %1011 = vmatpush.bf16.msra.mxu2 %v1888_v16  ;;  %v1905_v16 = vld [vmem:[#allocation8 + $0x290] sm:$0xff] }
 0x15c   :  { %v629_v17 = vpop.f32.mrf.mxu0 }
 0x15e   :  { %v643_v19 = vpop.f32.mrf.mxu1 }
 0x160   :  { %v615_v18 = vpop.f32.mrf.mxu3 }
 0x161   :  { %v616_v21 = vadd.f32 %v1933_v20, %v615_v18  ;;  %v727_v18 = vld [vmem:[%s2160_s2 + $0x5] sm:$0x1] }
 0x163   :  { %v630_v24 = vadd.f32 %v629_v17, %v616_v21  ;;  %v1879_v21 = vld [vmem:[#allocation8 + $0x1c0] sm:$0xff] }
 0x164   :  { %v631_v25 = vpop.f32.mrf.mxu0  ;;  %999 = vmatpush.bf16.msra.mxu1 %v1879_v21  ;;  %v1895_v21 = vld [vmem:[#allocation8 + $0x240] sm:$0xff] }
 0x165   :  { %v2126_v29 = vadd.f32 %v643_v19, %v630_v24 }
 0x166   :  { %v645_v27 = vpop.f32.mrf.mxu1 }
 0x168   :  { %v617_v22 = vpop.f32.mrf.mxu3  ;;  %1281 = vmatpush.bf16.msrb.mxu1 %v1918_v57 }
 0x169   :  { %v618_v23 = vadd.f32 %v1933_v20, %v617_v22  ;;  %v1871_v20 = vld [vmem:[#allocation8 + $0x180] sm:$0xff] }
 0x16a   :  { %v1887_v22 = vld [vmem:[#allocation8 + $0x200] sm:$0xff]  ;;  %986 = vmatpush.bf16.msra.mxu0 %v1871_v20  ;;  %v1912_v20 = vld [vmem:[#allocation8 + $0x2c8] sm:$0xff] }
 0x16b   :  { %v632_v26 = vadd.f32 %v631_v25, %v618_v23  ;;  %v740_v25 = vld [vmem:[%s2160_s2 + $0x6] sm:$0x1]  ;;  %1012 = vmatpush.bf16.msra.mxu2 %v1887_v22 }
 0x16c   :  { %1282 = vmatpush.bf16.msrb.mxu1 %v1917_v62  ;;  %v1903_v22 = vld [vmem:[#allocation8 + $0x280] sm:$0xff] }
 0x16d   :  { %v2124_v28 = vadd.f32 %v645_v27, %v632_v26 }
 0x16e   :  { %1268 = vmatpush.bf16.msrb.mxu0 %v1910_v56  ;;  %v1936_v56 = vld [vmem:[%s2160_s2 + $0x4] ss:$0 sm:$0xff] }
 0x16f   :  { %v664_v30 = vsel %vm54_vm0, %v2124_v28, 0.0 }
 0x170   :  { %v665_v31 = vadd.f32 %v664_v30, %v2126_v29  ;;  %1283 = vmatpush.bf16.msrb.mxu1 %v1916_v5 }
 0x172   :  { %v666_v32 = vrot.slane %v665_v31, 4  ;;  %1269 = vmatpush.bf16.msrb.mxu0 %v1909_v61 }
 0x174   :  { %v667_v33 = vadd.f32 %v666_v32, %v665_v31  ;;  %1284 = vmatpush.bf16.msrb.mxu1 %v1915_v9 }
 0x176   :  { %v668_v34 = vrot.slane %v667_v33, 2  ;;  %1270 = vmatpush.bf16.msrb.mxu0 %v1908_v4 }
 0x178   :  { %v669_v35 = vadd.f32 %v668_v34, %v667_v33 }
 0x17a   :  { %v670_v36 = vrot.slane %v669_v35, 1 }
 0x17c   :  { %v671_v37 = vadd.f32 %v670_v36, %v669_v35 }
 0x17e   :  { %688 = vmatmul.f32.vlgmr.msrb.gmra.mxu2 %v671_v37 }
 0x201   :  { %v689_v38 = vpop.f32.mrf.mxu2 }
 0x202   :  { %v2131_v39 = vmul.f32 0.010204081, %v689_v38 }
 0x204   :  { %v693_v40 = vperm.slane %v2131_v39, 0 }
 0x206   :  { %v694_v41 = vsub.f32 %v2126_v29, %v693_v40  ;;  %v695_v42 = vsub.f32 %v2124_v28, %v693_v40 }
 0x208   :  { %v696_v43 = vmul.f32 %v694_v41, %v694_v41  ;;  %v697_v44 = vmul.f32 %v695_v42, %v695_v42 }
 0x20a   :  { %v698_v45 = vsel %vm54_vm0, %v697_v44, 0.0 }
 0x20b   :  { %v699_v46 = vadd.f32 %v698_v45, %v696_v43 }
 0x20d   :  { %v700_v47 = vrot.slane %v699_v46, 4 }
 0x20f   :  { %v701_v48 = vadd.f32 %v700_v47, %v699_v46 }
 0x211   :  { %v702_v49 = vrot.slane %v701_v48, 2 }
 0x213   :  { %v703_v50 = vadd.f32 %v702_v49, %v701_v48 }
 0x215   :  { %v704_v51 = vrot.slane %v703_v50, 1 }
 0x217   :  { %v705_v52 = vadd.f32 %v704_v51, %v703_v50  ;;  %v1934_v51 = vld [vmem:[%s2160_s2 + $0x2] ss:$0 sm:$0xff] }
 0x219   :  { %722 = vmatmul.f32.vlgmr.msrb.gmra.mxu3 %v705_v52 }
 0x29c   :  { %v723_v59 = vpop.f32.mrf.mxu3 }
 0x29d   :  { %v726_v60 = vmul.f32 0.010204081, %v723_v59 }
 0x29f   :  { %v728_v0 = vadd.f32 1e-05, %v726_v60  ;;  %v1901_v60 = vld [vmem:[#allocation8 + $0x270] sm:$0xff] }
 0x2a0   :  { %1256 = vmatpush.bf16.msra.mxu3 %v1901_v60 }
 0x2a1   :  { %1937 = vrsqrt.f32 %v728_v0  ;;  %vm735_vm2 = vweird.f32 %v728_v0 }
 0x2a4   :  { %1257 = vmatpush.bf16.msra.mxu3 %v1900_v3 }
 0x2a7   :  { %v1938_v7 = vpop.eup %1937 }
 0x2a8   :  { %v730_v8 = vmul.f32 %v1938_v7, %v728_v0  ;;  %vm736_vm1 = vweird.f32 %v1938_v7 }
 0x2a9   :  { %vm737_vm3 = vmor %vm735_vm2, %vm736_vm1 }
 0x2aa   :  { %v731_v12 = vmul.f32 %v1938_v7, %v730_v8  ;;  %v1907_v8 = vld [vmem:[#allocation8 + $0x2a0] sm:$0xff] }
 0x2ab   :  { %1271 = vmatpush.bf16.msrb.mxu0 %v1907_v8 }
 0x2ac   :  { %v732_v13 = vmul.f32 0.5, %v731_v12  ;;  %v1906_v12 = vld [vmem:[#allocation8 + $0x298] sm:$0xff] }
 0x2ae   :  { %v733_v17 = vsub.f32 1.5, %v732_v13  ;;  %v1914_v13 = vld [vmem:[#allocation8 + $0x2d8] sm:$0xff] }
 0x2af   :  { %1272 = vmatpush.bf16.msrb.mxu0 %v1906_v12  ;;  %1285 = vmatpush.bf16.msrb.mxu1 %v1914_v13 }
 0x2b0   :  { %v734_v19 = vmul.f32 %v1938_v7, %v733_v17  ;;  %v1913_v17 = vld [vmem:[#allocation8 + $0x2d0] sm:$0xff] }
 0x2b2   :  { %v738_v23 = vsel %vm737_vm3, %v1938_v7, %v734_v19  ;;  %v1899_v7 = vld [vmem:[#allocation8 + $0x260] sm:$0xff]  ;;  %v1904_v19 = vld [vmem:[#allocation8 + $0x288] sm:$0xff] }
 0x2b3   :  { %v739_v24 = vmul.f32 %v738_v23, %v727_v18  ;;  %1258 = vmatpush.bf16.msra.mxu3 %v1899_v7  ;;  %1273 = vmatpush.bf16.msrb.mxu0 %v1905_v16  ;;  %v1896_v18 = vld [vmem:[#allocation8 + $0x248] sm:$0xff] }
 0x2b4   :  { %1286 = vmatpush.bf16.msrb.mxu1 %v1913_v17 }
 0x2b5   :  { %v741_v26 = vmul.f32 %v739_v24, %v2131_v39  ;;  %v743_v27 = vperm.slane %v739_v24, 0  ;;  %v1911_v24 = vld [vmem:[#allocation8 + $0x2c0] sm:$0xff] }
 0x2b7   :  { %v742_v30 = vsub.f32 %v740_v25, %v741_v26  ;;  %v744_v31 = vmul.f32 %v743_v27, %v2126_v29  ;;  %v745_v32 = vmul.f32 %v743_v27, %v2124_v28  ;;  %1259 = vmatpush.bf16.msra.mxu3 %v1898_v11  ;;  %1274 = vmatpush.bf16.msrb.mxu0 %v1904_v19  ;;  %v1926_v26 = vld [vmem:[#allocation8 + $0x338] sm:$0xff] }
 0x2b8   :  { %1287 = vmatpush.bf16.msrb.mxu1 %v1912_v20  ;;  %1362 = vmatpush.bf16.msrb.mxu2 %v1926_v26 }
 0x2b9   :  { %v746_v33 = vperm.slane %v742_v30, 0  ;;  %v1925_v30 = vld [vmem:[#allocation8 + $0x330] sm:$0xff] }
 0x2bb   :  { %v747_v34 = vadd.f32 %v746_v33, %v744_v31  ;;  %v748_v35 = vadd.f32 %v746_v33, %v745_v32  ;;  %1260 = vmatpush.bf16.msra.mxu3 %v1897_v15  ;;  %1275 = vmatpush.bf16.msrb.mxu0 %v1903_v22  ;;  %v1924_v31 = vld [vmem:[#allocation8 + $0x328] sm:$0xff]  ;;  %v1923_v33 = vld [vmem:[#allocation8 + $0x320] sm:$0xff] }
 0x2bc   :  { %1288 = vmatpush.bf16.msrb.mxu1 %v1911_v24  ;;  %1363 = vmatpush.bf16.msrb.mxu2 %v1925_v30 }
 0x2bd   :  { %v749_v36 = vmax.f32 %v747_v34, 0.0  ;;  %v750_v37 = vmax.f32 %v748_v35, 0.0 }
 0x2bf   :  { %751 = vst [vmem:[#allocation5] sm:$0xff] %v749_v36  ;;  %1261 = vmatpush.bf16.msra.mxu3 %v1896_v18 }
 0x2c0   :  { %752 = vst [vmem:[#allocation5 + $0x8] sm:$0x3f] %v750_v37  ;;  %1364 = vmatpush.bf16.msrb.mxu2 %v1924_v31 }
 0x2c3   :  { %1262 = vmatpush.bf16.msra.mxu3 %v1895_v21 }
 0x2c4   :  { %1365 = vmatpush.bf16.msrb.mxu2 %v1923_v33 }
 0x2c6   :  { %v753_v38 = vld [vmem:[#allocation5] ss:$2 sm:$0x7]  ;;  %v756_v40 = vld [vmem:[#allocation5 + $0x1] ss:$2 sm:$0x7] }
 0x2c7   :  { %754 = vst [vmem:[#allocation6 + $0x8] sm:$0x7] %v753_v38  ;;  %v762_v41 = vld [vmem:[#allocation5 + $0x7] ss:$2 sm:$0x7] }
 0x2c8   :  { %v764_v42 = vrot.slane %v762_v41, 5  ;;  %757 = vst [vmem:[#allocation6] sm:$0x7] %v756_v40  ;;  %v768_v39 = vld [vmem:[#allocation5 + $0x8] ss:$2 sm:$0x7] }
 0x2c9   :  { %v770_v43 = vrot.slane %v768_v39, 5  ;;  %v759_v44 = vld [vmem:[#allocation5 + $0x2] ss:$2 sm:$0x7] }
 0x2ca   :  { %766 = vst [vmem:[#allocation6 + $0x8] sm:$0x38] %v764_v42  ;;  %v774_v29 = vld [vmem:[#allocation5 + $0x9] ss:$2 sm:$0x7] }
 0x2cb   :  { %772 = vst [vmem:[#allocation6] sm:$0x38] %v770_v43  ;;  %v776_v28 = vrot.slane %v774_v29, 5  ;;  %v1922_v39 = vld [vmem:[#allocation8 + $0x318] sm:$0xff]  ;;  %v1921_v43 = vld [vmem:[#allocation8 + $0x310] sm:$0xff]  ;;  %v1919_v29 = vld [vmem:[#allocation8 + $0x300] sm:$0xff] }
 0x2cc   :  { %760 = vst [vmem:[#allocation6 + $0x10] sm:$0x7] %v759_v44  ;;  %1366 = vmatpush.bf16.msrb.mxu2 %v1922_v39  ;;  %v1920_v44 = vld [vmem:[#allocation8 + $0x308] sm:$0xff] }
 0x2cd   :  { %778 = vst [vmem:[#allocation6 + $0x10] sm:$0x38] %v776_v28 }
 0x2d0   :  { %1367 = vmatpush.bf16.msrb.mxu2 %v1921_v43 }
 0x2d1   :  { %v779_v45 = vld [vmem:[#allocation6 + $0x8] sm:$0x3f] }
 0x2d2   :  { %v782_v46 = vpack.c.bf16 %v779_v45, %v779_v45  ;;  %v780_v47 = vld [vmem:[#allocation6] sm:$0x3f] }
 0x2d3   :  { %v783_v48 = vpack.c.bf16 %v780_v47, %v780_v47 }
 0x2d4   :  { %987 = vmatmul.bf16.vlgmr.msra.gmra.mxu0 %v782_v46  ;;  %v781_v49 = vld [vmem:[#allocation6 + $0x10] sm:$0x3f]  ;;  %1368 = vmatpush.bf16.msrb.mxu2 %v1920_v44  ;;  %v1935_v46 = vld [vmem:[%s2160_s2 + $0x3] ss:$0 sm:$0xff] }
 0x2d5   :  { %1000 = vmatmul.bf16.vlgmr.msra.gmra.mxu1 %v783_v48  ;;  %v784_v50 = vpack.c.bf16 %v781_v49, %v781_v49 }
 0x2d7   :  { %1013 = vmatmul.bf16.vlgmr.msra.gmra.mxu2 %v784_v50 }
 0x2d8   :  { %1369 = vmatpush.bf16.msrb.mxu2 %v1919_v29 }
 0x351   :  { %v988_v52 = vpop.f32.mrf.mxu0 }
 0x352   :  { %v1001_v53 = vpop.f32.mrf.mxu1  ;;  %v989_v54 = vadd.f32 %v1934_v51, %v988_v52 }
 0x354   :  { %v1002_v58 = vadd.f32 %v1001_v53, %v989_v54 }
 0x359   :  { %v990_v59 = vpop.f32.mrf.mxu0 }
 0x35a   :  { %v1014_v63 = vpop.f32.mrf.mxu2  ;;  %v1003_v0 = vpop.f32.mrf.mxu1 }
 0x35b   :  { %v1015_v1 = vadd.f32 %v1014_v63, %v1002_v58 }
 0x35d   :  { %v1018_v2 = vmax.f32 %v1015_v1, 0.0 }
 0x35f   :  { %1019 = vst [vmem:[#allocation7] sm:$0x1] %v1018_v2  ;;  %v1692_v6 = vrot.slane %v1018_v2, 9 }
 0x360   :  { %1025 = vst.sshfl [vmem:[#allocation1] sm:$0xff pattern:$0x73625140] %v1018_v2 }
 0x361   :  { %1024 = vst [vmem:[#allocation7 + $0x2] sm:$0x1] %v1692_v6 }
 0x362   :  { %v1016_v10 = vpop.f32.mrf.mxu2 }
 0x367   :  { %v1027_v14 = vld [vmem:[#allocation1 + $0x1] ss:$4 sm:$0xff] }
 0x368   :  { %1029 = vst [vmem:[#allocation7 + $0x4] sm:$0x1] %v1027_v14 }
 0x369   :  { %1030 = vst.sshfl [vmem:[#allocation1] sm:$0xff pattern:$0x73625140] %v1018_v2 }
 0x370   :  { %v1032_v23 = vld [vmem:[#allocation1 + $0x1] ss:$4 sm:$0xff] }
 0x371   :  { %v1693_v25 = vrot.slane %v1032_v23, 9  ;;  %1037 = vst.sshfl [vmem:[#allocation1] sm:$0xff pattern:$0x73625140] %v1018_v2 }
 0x373   :  { %1036 = vst [vmem:[#allocation7 + $0x1] sm:$0x1] %v1693_v25 }
 0x378   :  { %v1039_v27 = vld [vmem:[#allocation1 + $0x2] ss:$4 sm:$0xff] }
 0x379   :  { %1041 = vst [vmem:[#allocation7 + $0x3] sm:$0x1] %v1039_v27 }
 0x37a   :  { %1042 = vst.sshfl [vmem:[#allocation1] sm:$0xff pattern:$0x73625140] %v1018_v2 }
 0x381   :  { %v1044_v32 = vld [vmem:[#allocation1 + $0x2] ss:$4 sm:$0xff] }
 0x382   :  { %v1694_v34 = vrot.slane %v1044_v32, 9 }
 0x384   :  { %1048 = vst [vmem:[#allocation7 + $0x5] sm:$0x1] %v1694_v34 }
 0x38b   :  { %v1049_v35 = vld [vmem:[#allocation7] sm:$0x3f] }
 0x38c   :  { %1051 = vst [vmem:[#allocation1] ss:$4 sm:$0xff] %v1049_v35 }
 0x393   :  { %v1052_v36 = vld.sshfl [vmem:[#allocation1] sm:$0xff pattern:$0x73625140]  ;;  %v1053_v37 = vld.sshfl [vmem:[#allocation1 + $0x8] sm:$0xff pattern:$0x73625140] }
 0x394   :  { %v1058_v38 = vpack.c.bf16 %v1052_v36, %v1052_v36  ;;  %v1059_v40 = vpack.c.bf16 %v1053_v37, %v1053_v37  ;;  %v1054_v41 = vld.sshfl [vmem:[#allocation1 + $0x10] sm:$0xff pattern:$0x73625140] }
 0x395   :  { %v1060_v42 = vpack.c.bf16 %v1054_v41, %v1054_v41 }
 0x396   :  { %1263 = vmatmul.bf16.vlgmr.msra.gmra.mxu3 %v1058_v38  ;;  %1276 = vmatmul.bf16.vlgmr.msrb.gmra.mxu0 %v1059_v40 }
 0x397   :  { %1289 = vmatmul.bf16.vlgmr.msrb.gmra.mxu1 %v1060_v42 }
 0x413   :  { %v1277_v28 = vpop.f32.mrf.mxu0 }
 0x414   :  { %v1290_v45 = vpop.f32.mrf.mxu1 }
 0x419   :  { %v1264_v47 = vpop.f32.mrf.mxu3 }
 0x41a   :  { %v1265_v48 = vadd.f32 %v1935_v46, %v1264_v47 }
 0x41b   :  { %v1279_v49 = vpop.f32.mrf.mxu0 }
 0x41c   :  { %v1278_v50 = vadd.f32 %v1277_v28, %v1265_v48  ;;  %v1292_v51 = vpop.f32.mrf.mxu1 }
 0x41e   :  { %v1291_v52 = vadd.f32 %v1290_v45, %v1278_v50 }
 0x420   :  { %v1294_v53 = vmax.f32 %v1291_v52, 0.0 }
 0x421   :  { %v1266_v54 = vpop.f32.mrf.mxu3 }
 0x422   :  { %v1295_v55 = vpack.c.bf16 %v1294_v53, %v1294_v53 }
 0x424   :  { %1370 = vmatmul.bf16.vlgmr.msrb.gmra.mxu2 %v1295_v55 }
 0x4a7   :  { %v1371_v57 = vpop.f32.mrf.mxu2 }
 0x4a8   :  { %v1372_v58 = vadd.f32 %v1936_v56, %v1371_v57 }
 0x4aa   :  { %1375 = vst [vmem:[#allocation11] sm:$0x3] %v1372_v58 }
 0x4ab   :  { %1386 = dma.vmem_to_hbm [thread:$0]  %s1382_s4, 32, %s1384_s7, [#allocation10]  }
 0x4af   :  { %v1373_v59 = vpop.f32.mrf.mxu2 }
 0x4b0   :  { %1989 = dma.done.wait [#allocation10], 32  }
 0x4b1   :  { %1990 = vsyncadd [#allocation10], 4294967264 }
 0x4b2   :  { %1391 = vsyncpa [#allocation9], 1 }
 0x4b3   :  { %1392 = vsyncpa [#allocation10], 1 }

</bundles_post_ra>
